<compile_context>
chip_gen: v5e
topology: v5e:2x2
jax: 0.10.0
libtpu: 0.0.40
codegen_flags: <defaults>
</compile_context>

<pallas_src>
import jax
import jax.numpy as jnp
from jax.experimental import pallas as pl
from jax.experimental.pallas import tpu as pltpu


def _round_up(x, m):
    return (x + m - 1) // m * m


def _vmem_budget_bytes():
    """Best-effort physical-VMEM query; conservative cross-generation fallback."""
    try:
        info = pltpu.get_tpu_info()
        cap = int(getattr(info, "vmem_capacity_bytes", 64 << 20))
    except Exception:
        cap = 64 << 20          # v7x per-TC VMEM (smallest of v5e/v6e/v7x)
    return max(16 << 20, cap // 2)   # leave headroom for Mosaic internal scratch


def _choose_batch_tile(B, max_tile=1024, min_split=256):
    """Pick the batch tile: as large as possible (grid-overhead bound kernel),
    but >= 2 grid steps when B is big enough so both TCs get work on v7x."""
    Bp = _round_up(B, 16)                     # bf16 output sublane packing
    if Bp < min_split:
        tb = Bp                               # one tile; splitting is pure overhead
    else:
        tb = min(max_tile, _round_up(pl.cdiv(Bp, 2), 16))
    b_pad = _round_up(B, tb)
    return tb, b_pad


def label_encoder_kernel(offsets_ref, sizes_ref, idx_ref, ft_ref, b_ref, out_ref):
    """One batch tile.

    offsets_ref : [L] int32 SMEM  start row of field i in the concatenated vocab
    sizes_ref   : [L] int32 SMEM  vocab size of field i
    idx_ref     : [TB, L] int32   raw label indices (padded batch rows carry -1)
    ft_ref      : [Vp, Hp] bf16   fused table  concat(E_i) @ W.T   (VMEM-resident)
    b_ref       : [1, Hp]  f32    fc bias (VMEM-resident)
    out_ref     : [TB, Hp] out_dtype
    """
    idx = idx_ref[...]
    TB, L = idx.shape
    Vp = ft_ref.shape[0]

    # multi_hot[b, v] = 1 iff some field i has a VALID index hitting row v of the
    # concatenated vocab.  Accumulate in int32 (native VALU on v5e), cast once.
    iota_v = jax.lax.broadcasted_iota(jnp.int32, (TB, Vp), 1)
    hot = jnp.zeros((TB, Vp), dtype=jnp.int32)
    for i in range(L):                         # L is small and static
        raw = idx[:, i:i + 1]                  # [TB, 1]
        valid = (raw >= 0) & (raw < sizes_ref[i])
        off = jnp.where(valid, raw + offsets_ref[i], -1)   # invalid -> no hot column
        hot = hot + (off == iota_v).astype(jnp.int32)
    multi_hot = hot.astype(jnp.bfloat16)       # exact: values are 0/1

    # Single MXU matmul: [TB, Vp]bf16 @ [Vp, Hp]bf16 -> f32 accumulate, + bias, ReLU.
    y = jnp.dot(multi_hot, ft_ref[...], preferred_element_type=jnp.float32)
    out_ref[...] = jnp.maximum(y + b_ref[...], 0.0).astype(out_ref.dtype)


def prepare_label_encoder_params(embed_tables, fc_weight, fc_bias,
                                 mxu_dtype=jnp.bfloat16):
    """Call-invariant parameter prep — do this ONCE at model init, not per step.

    embed_tables : list of [s_i, H_in] float arrays (nn.Embedding weights)
    fc_weight    : [H_out, H_in]  (PyTorch nn.Linear layout)
    fc_bias      : [H_out]
    """
    sizes = [int(t.shape[0]) for t in embed_tables]
    h_out = int(fc_weight.shape[0])
    v_total = int(sum(sizes))

    table = jnp.concatenate([t.astype(jnp.float32) for t in embed_tables], axis=0)
    # Linear fold: (sum_i E_i[x_i]) @ W.T == sum_i (E_i @ W.T)[x_i]
    fused = table @ fc_weight.astype(jnp.float32).T            # [V, H_out] f32

    v_pad = _round_up(v_total, 16)                              # bf16 sublane packing
    h_pad = _round_up(h_out, 128)                               # lane-dense output
    fused = jnp.pad(fused, ((0, v_pad - v_total), (0, h_pad - h_out)))
    fused = fused.astype(mxu_dtype)
    bias2d = jnp.pad(fc_bias.astype(jnp.float32),
                     (0, h_pad - h_out)).reshape(1, h_pad)
    offsets = jnp.asarray([sum(sizes[:i]) for i in range(len(sizes))], jnp.int32)
    sizes_arr = jnp.asarray(sizes, jnp.int32)

    # VMEM budget: keep the fully-resident fused table small enough for v5e's
    # 16 MiB default scoped VMEM (and leave room for double-buffered idx/out).
    table_bytes = v_pad * h_pad * jnp.dtype(mxu_dtype).itemsize
    assert table_bytes <= 12 * 1024 * 1024, (
        "fused table too large for a fully VMEM-resident one-hot matmul")
    # TODO(synk): for large V_total, add a vocab grid axis with an accumulator
    # scratch (reduction axis last, "arbitrary") or switch to a scalar-prefetched
    # row-gather kernel; on v5e the FLOP crossover happens at a smaller vocab.

    return fused, bias2d, offsets, sizes_arr, h_out


def label_encoder(idx, params, *, out_dtype=jnp.bfloat16, max_tile_b=1024,
                  return_padded=False):
    """idx: int [B, L]. Returns [B, h_out] in out_dtype (or the padded slab)."""
    fused_table, bias2d, offsets, sizes, h_out = params
    B, L = idx.shape
    v_pad, h_pad = fused_table.shape

    idx = idx.astype(jnp.int32)
    tb, b_pad = _choose_batch_tile(B, max_tile=max_tile_b)
    if b_pad != B:
        idx = jnp.pad(idx, ((0, b_pad - B), (0, 0)), constant_values=-1)

    out_isz = jnp.dtype(out_dtype).itemsize
    table_bytes = fused_table.size * fused_table.dtype.itemsize
    bias_bytes = bias2d.size * 4
    need = (table_bytes + bias_bytes
            + 2 * tb * L * 4            # double-buffered idx tiles
            + 2 * tb * h_pad * out_isz)  # double-buffered out tiles
    vmem_limit = int(min(need + (8 << 20), _vmem_budget_bytes()))

    cost = pl.CostEstimate(
        flops=2 * b_pad * v_pad * h_pad,
        transcendentals=0,
        bytes_accessed=(b_pad * L * 4 + table_bytes + bias_bytes
                        + b_pad * h_pad * out_isz))

    out = pl.pallas_call(
        label_encoder_kernel,
        out_shape=jax.ShapeDtypeStruct((b_pad, h_pad), out_dtype),
        grid_spec=pltpu.PrefetchScalarGridSpec(
            num_scalar_prefetch=2,                 # offsets, sizes -> SMEM
            grid=(b_pad // tb,),
            in_specs=[
                pl.BlockSpec((tb, L), lambda i, offs, szs: (i, 0)),        # streamed
                pl.BlockSpec((v_pad, h_pad), lambda i, offs, szs: (0, 0)),  # resident
                pl.BlockSpec((1, h_pad), lambda i, offs, szs: (0, 0)),      # resident
            ],
            out_specs=pl.BlockSpec((tb, h_pad), lambda i, offs, szs: (i, 0)),
        ),
        compiler_params=pltpu.CompilerParams(
            dimension_semantics=("parallel",),      # shard batch tiles across TCs
            vmem_limit_bytes=vmem_limit),
        cost_estimate=cost,
    )(offsets, sizes, idx, fused_table, bias2d)

    if return_padded:
        # NOTE: padded lanes (>= h_out) are exactly 0; padded batch rows (>= B)
        # hold ReLU(bias) garbage — callers taking the padded slab must ignore them.
        return out
    if b_pad != B or h_pad != h_out:
        out = out[:B, :h_out]                       # only pays the slice if padded
    return out


def label_encoder_ref(idx, embed_tables, fc_weight, fc_bias):
    """Pure-JAX f32 reference matching the PyTorch forward."""
    embs = [embed_tables[i][idx[:, i]] for i in range(len(embed_tables))]
    summed = jnp.sum(jnp.stack(embs, axis=-1), axis=-1)
    y = summed @ fc_weight.T + fc_bias
    return jnp.maximum(y, 0.0)


if __name__ == "__main__":
    # Small deterministic config: lane-dense H (128), batch 256 -> 2 grid steps.
    label_embed_sizes = [5, 7, 4]      # vocab size per label field
    hidden_size = 128
    batch = 256
    L = len(label_embed_sizes)

    key = jax.random.PRNGKey(0)
    keys = jax.random.split(key, L + 3)

    embed_tables = [
        jax.random.normal(keys[i], (s, hidden_size), dtype=jnp.float32)
        for i, s in enumerate(label_embed_sizes)
    ]
    fc_weight = jax.random.normal(keys[L], (hidden_size, hidden_size),
                                  dtype=jnp.float32) * 0.1
    fc_bias = jax.random.normal(keys[L + 1], (hidden_size,), dtype=jnp.float32) * 0.1

    cols = []
    for i, s in enumerate(label_embed_sizes):
        cols.append(jax.random.randint(jax.random.fold_in(keys[L + 2], i),
                                       (batch,), 0, s, dtype=jnp.int32))
    x = jnp.stack(cols, axis=1)        # [B, L] int32

    # Hoisted, call-invariant prep (concat + FC fold + bf16 cast) done once.
    params = prepare_label_encoder_params(embed_tables, fc_weight, fc_bias)

    out = label_encoder(x, params, out_dtype=jnp.bfloat16)
    out = jax.block_until_ready(out)

    ref = label_encoder_ref(x, embed_tables, fc_weight, fc_bias)
    assert out.shape == (batch, hidden_size)
    # bf16 table + bf16 output rounding (~0.4% relative each); post-ReLU values near
    # zero can have larger relative error, hence the loose absolute tolerance.
    err = jnp.max(jnp.abs(out.astype(jnp.float32) - ref))
    assert jnp.allclose(out.astype(jnp.float32), ref, atol=1e-1, rtol=5e-2), (
        "mismatch vs reference; max abs err = %e" % float(err))

    print("KERNEL_OK")
</pallas_src>

<mosaic_0001>
module attributes {stable_mosaic.version = 11 : i64} {
  func.func @label_encoder_kernel(%arg0: i32, %arg1: memref<3xi32, #tpu.memory_space<smem>>, %arg2: memref<3xi32, #tpu.memory_space<smem>>, %arg3: memref<128x3xi32, #tpu.memory_space<vmem>>, %arg4: memref<16x128xbf16, #tpu.memory_space<vmem>>, %arg5: memref<1x128xf32, #tpu.memory_space<vmem>>, %arg6: memref<128x128xbf16, #tpu.memory_space<vmem>>) attributes {dimension_semantics = [#tpu.dimension_semantics<parallel>], iteration_bounds = array<i64: 2>, scalar_prefetch = 2 : i64, scratch_operands = 0 : i64, tpu.core_type = #tpu.core_type<tc>, window_params = [{transform_indices = @transform_0, window_bounds = array<i64: 128, 3>}, {pipeline_mode = #tpu.pipeline_mode<synchronous>, transform_indices = @transform_1, window_bounds = array<i64: 16, 128>}, {pipeline_mode = #tpu.pipeline_mode<synchronous>, transform_indices = @transform_2, window_bounds = array<i64: 1, 128>}, {transform_indices = @transform_3, window_bounds = array<i64: 128, 128>}]} {
    %c0 = arith.constant 0 : index
    %c0_0 = arith.constant 0 : index
    %0 = vector.load %arg3[%c0, %c0_0] : memref<128x3xi32, #tpu.memory_space<vmem>>, vector<128x3xi32>
    %1 = tpu.iota {dimensions = array<i32: 1>} : vector<128x16xi32>
    %c0_i32 = arith.constant 0 : i32
    %2 = vector.broadcast %c0_i32 : i32 to vector<128x16xi32>
    %3 = vector.extract_strided_slice %0 {offsets = [0, 0], sizes = [128, 1], strides = [1, 1]} : vector<128x3xi32> to vector<128x1xi32>
    %c0_i32_1 = arith.constant 0 : i32
    %4 = vector.broadcast %c0_i32_1 : i32 to vector<128x1xi32>
    %5 = arith.cmpi sge, %3, %4 : vector<128x1xi32>
    %c0_2 = arith.constant 0 : index
    %6 = memref.load %arg2[%c0_2] : memref<3xi32, #tpu.memory_space<smem>>
    %7 = vector.broadcast %6 : i32 to vector<128x1xi32>
    %8 = arith.cmpi slt, %3, %7 : vector<128x1xi32>
    %9 = arith.andi %5, %8 : vector<128x1xi1>
    %c0_3 = arith.constant 0 : index
    %10 = memref.load %arg1[%c0_3] : memref<3xi32, #tpu.memory_space<smem>>
    %11 = vector.broadcast %10 : i32 to vector<128x1xi32>
    %12 = arith.addi %3, %11 : vector<128x1xi32>
    %c-1_i32 = arith.constant -1 : i32
    %13 = vector.broadcast %c-1_i32 : i32 to vector<128x1xi32>
    %14 = arith.select %9, %12, %13 : vector<128x1xi1>, vector<128x1xi32>
    %15 = vector.broadcast %14 : vector<128x1xi32> to vector<128x16xi32>
    %16 = arith.cmpi eq, %15, %1 : vector<128x16xi32>
    %17 = arith.extui %16 : vector<128x16xi1> to vector<128x16xi32>
    %18 = arith.addi %2, %17 : vector<128x16xi32>
    %19 = vector.extract_strided_slice %0 {offsets = [0, 1], sizes = [128, 1], strides = [1, 1]} : vector<128x3xi32> to vector<128x1xi32>
    %c0_i32_4 = arith.constant 0 : i32
    %20 = vector.broadcast %c0_i32_4 : i32 to vector<128x1xi32>
    %21 = arith.cmpi sge, %19, %20 : vector<128x1xi32>
    %c1 = arith.constant 1 : index
    %22 = memref.load %arg2[%c1] : memref<3xi32, #tpu.memory_space<smem>>
    %23 = vector.broadcast %22 : i32 to vector<128x1xi32>
    %24 = arith.cmpi slt, %19, %23 : vector<128x1xi32>
    %25 = arith.andi %21, %24 : vector<128x1xi1>
    %c1_5 = arith.constant 1 : index
    %26 = memref.load %arg1[%c1_5] : memref<3xi32, #tpu.memory_space<smem>>
    %27 = vector.broadcast %26 : i32 to vector<128x1xi32>
    %28 = arith.addi %19, %27 : vector<128x1xi32>
    %c-1_i32_6 = arith.constant -1 : i32
    %29 = vector.broadcast %c-1_i32_6 : i32 to vector<128x1xi32>
    %30 = arith.select %25, %28, %29 : vector<128x1xi1>, vector<128x1xi32>
    %31 = vector.broadcast %30 : vector<128x1xi32> to vector<128x16xi32>
    %32 = arith.cmpi eq, %31, %1 : vector<128x16xi32>
    %33 = arith.extui %32 : vector<128x16xi1> to vector<128x16xi32>
    %34 = arith.addi %18, %33 : vector<128x16xi32>
    %35 = vector.extract_strided_slice %0 {offsets = [0, 2], sizes = [128, 1], strides = [1, 1]} : vector<128x3xi32> to vector<128x1xi32>
    %c0_i32_7 = arith.constant 0 : i32
    %36 = vector.broadcast %c0_i32_7 : i32 to vector<128x1xi32>
    %37 = arith.cmpi sge, %35, %36 : vector<128x1xi32>
    %c2 = arith.constant 2 : index
    %38 = memref.load %arg2[%c2] : memref<3xi32, #tpu.memory_space<smem>>
    %39 = vector.broadcast %38 : i32 to vector<128x1xi32>
    %40 = arith.cmpi slt, %35, %39 : vector<128x1xi32>
    %41 = arith.andi %37, %40 : vector<128x1xi1>
    %c2_8 = arith.constant 2 : index
    %42 = memref.load %arg1[%c2_8] : memref<3xi32, #tpu.memory_space<smem>>
    %43 = vector.broadcast %42 : i32 to vector<128x1xi32>
    %44 = arith.addi %35, %43 : vector<128x1xi32>
    %c-1_i32_9 = arith.constant -1 : i32
    %45 = vector.broadcast %c-1_i32_9 : i32 to vector<128x1xi32>
    %46 = arith.select %41, %44, %45 : vector<128x1xi1>, vector<128x1xi32>
    %47 = vector.broadcast %46 : vector<128x1xi32> to vector<128x16xi32>
    %48 = arith.cmpi eq, %47, %1 : vector<128x16xi32>
    %49 = arith.extui %48 : vector<128x16xi1> to vector<128x16xi32>
    %50 = arith.addi %34, %49 : vector<128x16xi32>
    %51 = arith.sitofp %50 : vector<128x16xi32> to vector<128x16xbf16>
    %c0_10 = arith.constant 0 : index
    %c0_11 = arith.constant 0 : index
    %52 = vector.load %arg4[%c0_10, %c0_11] : memref<16x128xbf16, #tpu.memory_space<vmem>>, vector<16x128xbf16>
    %cst = arith.constant dense<0.000000e+00> : vector<128x128xf32>
    %53 = tpu.matmul %51, %52, %cst {dimension_numbers = #tpu.dot_dimension_numbers<[1], [0], [0], [1], [0, 0, 1, 1], [], []>} : vector<128x16xbf16>, vector<16x128xbf16>, vector<128x128xf32> -> vector<128x128xf32>
    %c0_12 = arith.constant 0 : index
    %c0_13 = arith.constant 0 : index
    %54 = vector.load %arg5[%c0_12, %c0_13] : memref<1x128xf32, #tpu.memory_space<vmem>>, vector<1x128xf32>
    %55 = vector.broadcast %54 : vector<1x128xf32> to vector<128x128xf32>
    %56 = arith.addf %53, %55 : vector<128x128xf32>
    %cst_14 = arith.constant 0.000000e+00 : f32
    %57 = vector.broadcast %cst_14 : f32 to vector<128x128xf32>
    %58 = arith.maximumf %56, %57 : vector<128x128xf32>
    %59 = arith.truncf %58 : vector<128x128xf32> to vector<128x128xbf16>
    %c0_15 = arith.constant 0 : index
    %c0_16 = arith.constant 0 : index
    %60 = vector.load %arg6[%c0_15, %c0_16] : memref<128x128xbf16, #tpu.memory_space<vmem>>, vector<128x128xbf16>
    tpu.vector_store %arg6[%c0_15, %c0_16], %59 {strides = array<i32>} : memref<128x128xbf16, #tpu.memory_space<vmem>>, vector<128x128xbf16>,
    return
  }
  func.func @transform_0(%arg0: i32, %arg1: memref<3xi32, #tpu.memory_space<smem>>, %arg2: memref<3xi32, #tpu.memory_space<smem>>) -> (i32, i32) {
    %c0_i32 = arith.constant 0 : i32
    %c0_i32_0 = arith.constant 0 : i32
    return %arg0, %c0_i32 : i32, i32
  }
  func.func @transform_1(%arg0: i32, %arg1: memref<3xi32, #tpu.memory_space<smem>>, %arg2: memref<3xi32, #tpu.memory_space<smem>>) -> (i32, i32) {
    %c0_i32 = arith.constant 0 : i32
    %c0_i32_0 = arith.constant 0 : i32
    %c0_i32_1 = arith.constant 0 : i32
    return %c0_i32, %c0_i32_0 : i32, i32
  }
  func.func @transform_2(%arg0: i32, %arg1: memref<3xi32, #tpu.memory_space<smem>>, %arg2: memref<3xi32, #tpu.memory_space<smem>>) -> (i32, i32) {
    %c0_i32 = arith.constant 0 : i32
    %c0_i32_0 = arith.constant 0 : i32
    %c0_i32_1 = arith.constant 0 : i32
    return %c0_i32, %c0_i32_0 : i32, i32
  }
  func.func @transform_3(%arg0: i32, %arg1: memref<3xi32, #tpu.memory_space<smem>>, %arg2: memref<3xi32, #tpu.memory_space<smem>>) -> (i32, i32) {
    %c0_i32 = arith.constant 0 : i32
    %c0_i32_0 = arith.constant 0 : i32
    return %arg0, %c0_i32 : i32, i32
  }
}

</mosaic_0001>

<bundles_post_ra>
// kernel: tpu_custom_call.1
= control target key start
LH: loop header
LB: loop body
LE: loop exit
PB: predicated region body
PF: predicated region fallthrough
CT: control target
= control target key end

     0   :  { %s1174_s24 = smov [#allocation3]   ;;  %s1175_s25 = smov [#allocation4]   ;;  %s1981_s0 = inlined_call_operand.vmem [shape: s32[3], index: 0, kind: input, shape index: {}]   ;;  %s1982_s2 = inlined_call_operand.vmem [shape: s32[256,3], index: 2, kind: input, shape index: {}]   ;;  %s1983_s3 = inlined_call_operand.vmem [shape: bf16[16,128], index: 3, kind: input, shape index: {}]   ;;  %s1984_s4 = inlined_call_operand.vmem [shape: f32[1,128], index: 4, kind: input, shape index: {}]   ;;  %s1985_s5 = inlined_call_operand.hbm [shape: bf16[256,128], index: 5, kind: output, shape index: {}]   ;;  %s1986_s1 = inlined_call_operand.vmem [shape: s32[3], index: 1, kind: input, shape index: {}]  }
   0x1   :  { %s11_s20 = sshll.u32 %s1981_s0, 4  ;;  %s16_s23 = sshll.u32 %s1986_s1, 4  ;;  %s12_s20 = int_to_ptr.vmem [resolvable:$true] %s11_s20  ;;  %s17_s23 = int_to_ptr.vmem [resolvable:$true] %s16_s23 }
   0x2   :  { %14 = dma.vmem_to_smem %s12_s20, 16, %s1174_s24, [#allocation2] }
   0x3   :  { %19 = dma.vmem_to_smem %s17_s23, 16, %s1175_s25, [#allocation2] }
   0x4   :  { %1152 = dma.done.wait [#allocation2], 32 }
   0x5   :  { %1153 = vsyncadd [#allocation2], 4294967264 }
   0x6   :  { %22 = sfence }
   0x7   :  { %23 = vsyncpa [#allocation6], 0 }
   0x8   :  { %25 = vsyncpa [#allocation6 + $0x1], 0  ;;  %s1217_s26 = smov 0   ;;  %s1219_s27 = smov 0  }
   0x9   :  { %s1221_s0 = smov 0   ;;  %s1223_s28 = smov 0  }
   0xa LB: > { %s1238_s1 = sadd.s32 4294967295, %s1172_s28   ;;  %s934_s29 = sadd.s32 4294967294, %s1172_s28   ;;  %s1172_s28 = sphi %s1223_s28, %s2039_s28   ;;  %s1168_s0 = sphi %s1221_s0, %s2038_s0   ;;  %s1164_s27 = sphi %s1219_s27, %s2037_s27   ;;  %s1160_s26 = sphi %s1217_s26, %s2036_s26  }
   0xb   : > { %s1242_s30 = sadd.s32 1, %s1172_s28   ;;  %s106_s6 = sadd.s32 1, %s1168_s0 }
   0xc   : > { %s103_s7 = ssub.s32 %s1172_s28, %s1242_s30  ;;  %p116_p0 = scmp.ne.s32.totalorder %s1168_s0, %s1164_s27 }
   0xd   : > { %p104_p1 = scmp.eq.s32.totalorder %s103_s7, 0  ;;  %p117_p2 = scmp.eq.s32.totalorder %s1238_s1, 1 }
   0xe   : > { %p122_p3 = scmp.ne.s32.totalorder %s1164_s27, %s1160_s26  ;;  %p123_p4 = scmp.eq.s32.totalorder %s934_s29, 1 }
   0xf   : > { %s1253_s8 = scalar_select %p104_p1, %s1168_s0, %s106_s6  }
  0x10   : > { %p1255_p5 = por %p117_p2, %p116_p0  ;;  %p1259_p6 = por %p123_p4, %p122_p3 }
  0x11   : > { %p937_p7 = scmp.ge.s32.totalorder %s1172_s28, 1  ;;  %p156_p8 = scmp.lt.s32.totalorder %s1172_s28, 3 }
  0x13   : > { %p157_p9 = pnand %p937_p7, %p156_p8 }
  0x14   : > { %s939_s11 = sshll.u32 (!%p157_p9), %s1238_s1, 4  ;;  %s943_s12 = sld [smem:[#allocation4 + $0x2]] (!%p157_p9) }
  0x15   : > { %160 = sbr.rel (%p157_p9) target bundleno = 447 (0x1bf), region = 32  ;;  %p181_p10 = scmp.lt.s32.totalorder (!%p157_p9), %s939_s11, 31 }
  0x16   : > { %s944_s13 = sld [smem:[#allocation3 + $0x2]] (!%p157_p9)  ;;  %s177_s29 = sand.u32 (!%p157_p9), 1, %s1164_s27  }
  0x17   : > { %s222_s14 = sld [smem:[#allocation4]] (!%p157_p9)  ;;  %s938_s6 = sshll.u32 (!%p157_p9), %s177_s29, 6 }
  0x18   : > { %s256_s15 = sld [smem:[#allocation3]] (!%p157_p9)  ;;  %s1925_s7 = scalar_lea.vmem (!%p157_p9), [#allocation5], %s938_s6 }
  0x19   : > { %s941_s20 = sld [smem:[#allocation4 + $0x1]] (!%p157_p9) }
  0x1a   : > { %v1176_v0 = vmov 2   ;;  %v1177_v1 = vmov 0   ;;  %s2041_s11 = smov (!%p181_p10, %s939_s11), 31  ;;  %v1274_v2 = vstv %s943_s12  ;;  %s942_s21 = sld [smem:[#allocation3 + $0x1]]  ;;  %v1178_v58 = vmov 1  }
  0x1b   : > { %1066 = vset.pattern.permute.xlu0 %v1176_v0  ;;  %1061 = vset.pattern.permute.xlu2 %v1177_v1  ;;  %s940_s16 = sshll.u32 %s2041_s11, 3  ;;  %s963_s11 = sshll.u32 %s1238_s1, 6 }
  0x1c   : > { %1060 = vset.pattern.permute.xlu1 %v1177_v1  ;;  %s1272_s19 = scalar_lea.vmem %s1982_s2, %s940_s16  ;;  %v1279_v4 = vstv %s944_s13  ;;  %s857_s1 = scalar_lea.sflag [#allocation6], %s177_s29 }
  0x1d   : > { %v1277_v3 = vld [vmem:[%s1272_s19 + $0x60] sm:$0xff]  ;;  %v1285_v6 = vld [vmem:[%s1272_s19 + $0x10] sm:$0xff]  ;;  %v1294_v8 = vld [vmem:[%s1272_s19 + $0x28] sm:$0xff]  ;;  %v1298_v9 = vstv %s222_s14  ;;  %s868_s14 = scalar_lea.hbm %s1985_s5, %s963_s11 }
  0x1e   : > { %v1282_v5 = vld [vmem:[%s1272_s19 + $0x20] sm:$0xff]  ;;  %vm218_vm0 = vcmp.ge.s32.totalorder %v1277_v3, 0  ;;  %vm548_vm1 = vcmp.lt.s32.totalorder %v1277_v3, %v1274_v2  ;;  %v582_v7 = vadd.s32 %v1279_v4, %v1277_v3  ;;  %vm1992_vm4 = vcmp.ge.s32.totalorder %v1285_v6, 0  ;;  %v1302_v10 = vld [vmem:[%s1272_s19 + $0x18] sm:$0xff]  ;;  %v1351_v23 = vld [vmem:[%s1272_s19 + $0x8] sm:$0xff]  ;;  %s871_s16 = sshll.u32 %s868_s14, 4  ;;  %s872_s16 = int_to_ptr.hbm [resolvable:$true] %s871_s16 }
  0x1f   : > { %vm210_vm2 = vcmp.ge.s32.totalorder %v1282_v5, 0  ;;  %vm564_vm3 = vmand %vm218_vm0, %vm548_vm1  ;;  %v1305_v11 = vld [vmem:[%s1272_s19] sm:$0xff]  ;;  %vm228_vm5 = vcmp.lt.s32.totalorder %v1282_v5, %v1298_v9  ;;  %v1309_v13 = vstv %s256_s15  ;;  %vm226_vm6 = vcmp.lt.s32.totalorder %v1285_v6, %v1298_v9  ;;  %v1357_v26 = vld [vmem:[%s1272_s19 + $0x38] sm:$0xff]  ;;  %s869_s15 = sshll.u32 %s1925_s7, 4  ;;  %s1122_s17 = sshra.s32 %s872_s16, 4  ;;  %s870_s15 = int_to_ptr.vmem [resolvable:$true] %s869_s15  ;;  %s1123_s17 = int_to_ptr.hbm [resolvable:$true] %s1122_s17 }
  0x20   : > { %v598_v12 = vsel %vm564_vm3, %v582_v7, 4294967295  ;;  %vm244_vm7 = vmand %vm210_vm2, %vm228_vm5  ;;  %v262_v14 = vadd.s32 %v1309_v13, %v1282_v5  ;;  %v260_v15 = vadd.s32 %v1309_v13, %v1285_v6  ;;  %vm211_vm8 = vcmp.ge.s32.totalorder %v1294_v8, 0  ;;  %v1354_v25 = vld [vmem:[%s1272_s19 + $0x40] sm:$0xff]  ;;  %v1394_v34 = vld [vmem:[%s1272_s19 + $0x30] sm:$0xff]  ;;  %s1124_s18 = scalar_lea.hbm %s1123_s17, 64  ;;  %p1129_p0 = scmp.lt.s32.totalorder %s1123_s17, %s1985_s5 }
  0x21   : > { %639 = vperm.xlu0 %1066, %v598_v12   ;;  %vm229_vm9 = vcmp.lt.s32.totalorder %v1294_v8, %v1298_v9  ;;  %vm242_vm10 = vmand %vm1992_vm4, %vm226_vm6  ;;  %vm1987_vm11 = vcmp.ge.s32.totalorder %v1302_v10, 0  ;;  %vm206_vm12 = vcmp.ge.s32.totalorder %v1305_v11, 0  ;;  %vm224_vm13 = vcmp.lt.s32.totalorder %v1305_v11, %v1298_v9  ;;  %v1397_v36 = vld [vmem:[%s1272_s19 + $0x58] sm:$0xff]  ;;  %v1400_v37 = vld [vmem:[%s1272_s19 + $0x50] sm:$0xff]  ;;  %p1125_p11 = scmp.ne.s32.totalorder %s1123_s17, %s1124_s18 }
  0x22   : > { %v278_v16 = vsel %vm244_vm7, %v262_v14, 4294967295  ;;  %v276_v17 = vsel %vm242_vm10, %v260_v15, 4294967295  ;;  %vm227_vm14 = vcmp.lt.s32.totalorder %v1302_v10, %v1298_v9  ;;  %v258_v18 = vadd.s32 %v1309_v13, %v1305_v11  ;;  %vm1334_vm15 = vmand %vm211_vm8, %vm229_vm9  ;;  %v1432_v44 = vld [vmem:[%s1272_s19 + $0x48] sm:$0xff]  ;;  %v1495_v7 = vld [vmem:[%s1272_s19 + $0x70] sm:$0xff] }
  0x23   : > { %303 = vperm.xlu2 %1061, %v278_v16   ;;  %297 = vperm.xlu1 %1060, %v276_v17   ;;  %v263_v20 = vadd.s32 %v1309_v13, %v1294_v8  ;;  %v261_v21 = vadd.s32 %v1309_v13, %v1302_v10  ;;  %vm240_vm1 = vmand %vm206_vm12, %vm224_vm13  ;;  %vm207_vm5 = vcmp.ge.s32.totalorder %v1351_v23, 0  ;;  %vm225_vm6 = vcmp.lt.s32.totalorder %v1351_v23, %v1298_v9  ;;  %v1437_v47 = vld [vmem:[%s1272_s19 + $0x68] sm:$0xff]  ;;  %p1126_p12 = pnand %p1125_p11, %p1255_p5 }
  0x24   : > { %vm1346_vm3 = vmand %vm1987_vm11, %vm227_vm14  ;;  %v274_v24 = vsel %vm240_vm1, %v258_v18, 4294967295  ;;  %vm214_vm7 = vcmp.ge.s32.totalorder %v1354_v25, 0  ;;  %vm232_vm9 = vcmp.lt.s32.totalorder %v1354_v25, %v1298_v9  ;;  %vm1988_vm10 = vcmp.ge.s32.totalorder %v1357_v26, 0 }
  0x25   : > { %v279_v27 = vsel %vm1334_vm15, %v263_v20, 4294967295  ;;  %v277_v28 = vsel %vm1346_vm3, %v261_v21, 4294967295  ;;  %vm231_vm13 = vcmp.lt.s32.totalorder %v1357_v26, %v1298_v9  ;;  %v259_v29 = vadd.s32 %v1309_v13, %v1351_v23  ;;  %vm241_vm14 = vmand %vm207_vm5, %vm225_vm6  ;;  %p1127_p13 = pneg %p1126_p12 }
  0x26   : > { %vm1379_vm15 = vmand %vm214_vm7, %vm232_vm9  ;;  %v266_v31 = vadd.s32 %v1309_v13, %v1354_v25  ;;  %v265_v32 = vadd.s32 %v1309_v13, %v1357_v26  ;;  %vm1990_vm3 = vcmp.ge.s32.totalorder %v1394_v34, 0  ;;  %vm230_vm6 = vcmp.lt.s32.totalorder %v1394_v34, %v1298_v9 }
  0x27   : > { %vm1389_vm1 = vmand %vm1988_vm10, %vm231_vm13  ;;  %v275_v35 = vsel %vm241_vm14, %v259_v29, 4294967295  ;;  %vm1989_vm9 = vcmp.ge.s32.totalorder %v1397_v36, 0  ;;  %vm235_vm13 = vcmp.lt.s32.totalorder %v1397_v36, %v1298_v9  ;;  %vm1991_vm14 = vcmp.ge.s32.totalorder %v1400_v37, 0 }
  0x28   : > { %v282_v38 = vsel %vm1379_vm15, %v266_v31, 4294967295  ;;  %v281_v39 = vsel %vm1389_vm1, %v265_v32, 4294967295  ;;  %vm234_vm15 = vcmp.lt.s32.totalorder %v1400_v37, %v1298_v9  ;;  %v264_v40 = vadd.s32 %v1309_v13, %v1394_v34  ;;  %vm246_vm1 = vmand %vm1990_vm3, %vm230_vm6 }
  0x29   : > { %1067 = vset.pattern.permute.xlu0 %v1177_v1  ;;  %v269_v41 = vadd.s32 %v1309_v13, %v1397_v36  ;;  %vm1423_vm11 = vmand %vm1989_vm9, %vm235_vm13  ;;  %v268_v43 = vadd.s32 %v1309_v13, %v1400_v37  ;;  %v1439_v49 = vstv %s941_s20  ;;  %vm215_vm6 = vcmp.ge.s32.totalorder %v1432_v44, 0 }
  0x2a   : > { %291 = vperm.xlu0 %1067, %v274_v24   ;;  %vm250_vm10 = vmand %vm1991_vm14, %vm234_vm15  ;;  %v280_v45 = vsel %vm246_vm1, %v264_v40, 4294967295  ;;  %vm233_vm13 = vcmp.lt.s32.totalorder %v1432_v44, %v1298_v9  ;;  %vm219_vm9 = vcmp.ge.s32.totalorder %v1437_v47, 0  ;;  %vm237_vm15 = vcmp.lt.s32.totalorder %v1437_v47, %v1298_v9 }
  0x2b   : > { %306 = vperm.xlu2 %1061, %v279_v27   ;;  %300 = vperm.xlu1 %1060, %v277_v28   ;;  %v285_v46 = vsel %vm1423_vm11, %v269_v41, 4294967295  ;;  %v284_v48 = vsel %vm250_vm10, %v268_v43, 4294967295  ;;  %v1447_v50 = vstv %s942_s21  ;;  %v267_v51 = vadd.s32 %v1309_v13, %v1432_v44  ;;  %vm249_vm10 = vmand %vm215_vm6, %vm233_vm13  ;;  %s1128_s21 = scalar_lea.hbm %s1985_s5, 128 }
  0x2c   : > { %vm380_vm11 = vcmp.lt.s32.totalorder %v1354_v25, %v1439_v49  ;;  %v271_v52 = vadd.s32 %v1309_v13, %v1437_v47  ;;  %vm253_vm1 = vmand %vm219_vm9, %vm237_vm15  ;;  %v414_v53 = vadd.s32 %v1447_v50, %v1354_v25  ;;  %vm236_vm14 = vcmp.lt.s32.totalorder %v1277_v3, %v1298_v9  ;;  %p1130_p1 = scmp.lt.s32.totalorder %s1128_s21, %s1124_s18 }
  0x2d   : > { %vm396_vm3 = vmand %vm214_vm7, %vm380_vm11  ;;  %v283_v54 = vsel %vm249_vm10, %v267_v51, 4294967295  ;;  %vm385_vm13 = vcmp.lt.s32.totalorder %v1437_v47, %v1439_v49  ;;  %v270_v57 = vadd.s32 %v1309_v13, %v1277_v3  ;;  %vm384_vm15 = vcmp.lt.s32.totalorder %v1277_v3, %v1439_v49 }
  0x2e   : > { %v287_v55 = vsel %vm253_vm1, %v271_v52, 4294967295  ;;  %v430_v56 = vsel %vm396_vm3, %v414_v53, 4294967295  ;;  %vm1474_vm11 = vmand %vm218_vm0, %vm236_vm14  ;;  %vm376_vm3 = vcmp.lt.s32.totalorder %v1282_v5, %v1439_v49  ;;  %v1488_v61 = vadd.s32 %v1447_v50, %v1282_v5  ;;  %p1131_p2 = por %p1130_p1, %p1129_p0 }
  0x2f   : > { %vm1482_vm10 = vmand %vm219_vm9, %vm385_vm13  ;;  %v419_v62 = vadd.s32 %v1447_v50, %v1437_v47  ;;  %v418_v63 = vadd.s32 %v1447_v50, %v1277_v3  ;;  %v286_v14 = vsel %vm1474_vm11, %v270_v57, 4294967295  ;;  %vm220_vm13 = vcmp.ge.s32.totalorder %v1495_v7, 0 }
  0x30   : > { %vm1499_vm14 = vmand %vm210_vm2, %vm376_vm3  ;;  %vm238_vm4 = vcmp.lt.s32.totalorder %v1495_v7, %v1298_v9  ;;  %v272_v3 = vadd.s32 %v1309_v13, %v1495_v7  ;;  %vm544_vm11 = vcmp.lt.s32.totalorder %v1354_v25, %v1274_v2  ;;  %vm536_vm3 = vcmp.lt.s32.totalorder %v1305_v11, %v1274_v2  ;;  %p1132_p3 = pnand %p1131_p2, %p1127_p13 }
  0x31   : > { %vm400_vm1 = vmand %vm218_vm0, %vm384_vm15  ;;  %v426_v15 = vsel %vm1499_vm14, %v1488_v61, 4294967295  ;;  %v435_v16 = vsel %vm1482_vm10, %v419_v62, 4294967295  ;;  %vm545_vm15 = vcmp.lt.s32.totalorder %v1432_v44, %v1274_v2  ;;  %v1528_v18 = vadd.s32 %v1279_v4, %v1305_v11 }
  0x32   : > { %294 = vperm.xlu0 %1067, %v275_v35   ;;  %v434_v17 = vsel %vm400_vm1, %v418_v63, 4294967295  ;;  %vm254_vm0 = vmand %vm220_vm13, %vm238_vm4  ;;  %v579_v22 = vadd.s32 %v1279_v4, %v1432_v44  ;;  %v578_v24 = vadd.s32 %v1279_v4, %v1354_v25  ;;  %v1565_v25 = vadd.s32 %v1279_v4, %v1282_v5 }
  0x33   : > { %315 = vperm.xlu2 %1061, %v282_v38   ;;  %312 = vperm.xlu1 %1060, %v281_v39   ;;  %vm1532_vm10 = vmand %vm206_vm12, %vm536_vm3  ;;  %v288_v20 = vsel %vm254_vm0, %v272_v3, 4294967295  ;;  %vm381_vm0 = vcmp.lt.s32.totalorder %v1432_v44, %v1439_v49  ;;  %v415_v31 = vadd.s32 %v1447_v50, %v1432_v44  ;;  %v575_v35 = vadd.s32 %v1279_v4, %v1294_v8  ;;  %v1616_v44 = vld [vmem:[%s1272_s19 + $0x78] sm:$0xff] }
  0x34   : > { %vm1538_vm4 = vmand %vm215_vm6, %vm545_vm15  ;;  %v586_v27 = vsel %vm1532_vm10, %v1528_v18, 4294967295  ;;  %vm540_vm15 = vcmp.lt.s32.totalorder %v1282_v5, %v1274_v2  ;;  %v583_v39 = vadd.s32 %v1279_v4, %v1437_v47  ;;  %v406_v42 = vadd.s32 %v1447_v50, %v1305_v11 }
  0x35   : > { %vm1551_vm1 = vmand %vm214_vm7, %vm544_vm11  ;;  %v595_v29 = vsel %vm1538_vm4, %v579_v22, 4294967295  ;;  %vm549_vm11 = vcmp.lt.s32.totalorder %v1437_v47, %v1274_v2  ;;  %vm372_vm4 = vcmp.lt.s32.totalorder %v1305_v11, %v1439_v49  ;;  %v273_v11 = vadd.s32 %v1309_v13, %v1616_v44 }
  0x36   : > { %v594_v30 = vsel %vm1551_vm1, %v578_v24, 4294967295  ;;  %vm1571_vm7 = vmand %vm210_vm2, %vm540_vm15  ;;  %vm541_vm2 = vcmp.lt.s32.totalorder %v1294_v8, %v1274_v2  ;;  %vm377_vm15 = vcmp.lt.s32.totalorder %v1294_v8, %v1439_v49  ;;  %v421_v13 = vadd.s32 %v1447_v50, %v1616_v44 }
  0x37   : > { %vm1581_vm3 = vmand %vm215_vm6, %vm381_vm0  ;;  %v590_v5 = vsel %vm1571_vm7, %v1565_v25, 4294967295  ;;  %vm221_vm7 = vcmp.ge.s32.totalorder %v1616_v44, 0  ;;  %v571_v53 = vadd.s32 %v1279_v4, %v1351_v23  ;;  %vm2025_vm14 = vcmp.ge.s32.totalorder %v1285_v6, 0 }
  0x38   : > { %vm1596_vm6 = vmand %vm211_vm8, %vm541_vm2  ;;  %v431_v41 = vsel %vm1581_vm3, %v415_v31, 4294967295  ;;  %vm387_vm2 = vcmp.lt.s32.totalorder %v1616_v44, %v1439_v49  ;;  %v416_v59 = vadd.s32 %v1447_v50, %v1400_v37  ;;  %vm2027_vm10 = vcmp.ge.s32.totalorder %v1400_v37, 0 }
  0x39   : > { %v591_v40 = vsel %vm1596_vm6, %v575_v35, 4294967295  ;;  %vm565_vm1 = vmand %vm219_vm9, %vm549_vm11  ;;  %vm239_vm11 = vcmp.lt.s32.totalorder %v1616_v44, %v1298_v9  ;;  %vm537_vm6 = vcmp.lt.s32.totalorder %v1351_v23, %v1274_v2  ;;  %v576_v60 = vadd.s32 %v1279_v4, %v1394_v34 }
  0x3a   : > { %309 = vperm.xlu0 %1067, %v280_v45   ;;  %vm388_vm0 = vmand %vm206_vm12, %vm372_vm4  ;;  %v599_v43 = vsel %vm565_vm1, %v583_v39, 4294967295  ;;  %vm373_vm12 = vcmp.lt.s32.totalorder %v1351_v23, %v1439_v49  ;;  %v420_v12 = vadd.s32 %v1447_v50, %v1495_v7  ;;  %v581_v3 = vadd.s32 %v1279_v4, %v1397_v36 }
  0x3b   : > { %324 = vperm.xlu2 %1061, %v285_v46   ;;  %321 = vperm.xlu1 %1060, %v284_v48   ;;  %v422_v45 = vsel %vm388_vm0, %v406_v42, 4294967295  ;;  %v411_v46 = vadd.s32 %v1447_v50, %v1294_v8  ;;  %vm393_vm9 = vmand %vm211_vm8, %vm377_vm15  ;;  %v407_v48 = vadd.s32 %v1447_v50, %v1351_v23  ;;  %vm374_vm0 = vcmp.lt.s32.totalorder %v1285_v6, %v1439_v49 }
  0x3c   : > { %vm1632_vm3 = vmand %vm221_vm7, %vm239_vm11  ;;  %vm382_vm11 = vcmp.lt.s32.totalorder %v1400_v37, %v1439_v49  ;;  %v580_v18 = vadd.s32 %v1279_v4, %v1400_v37  ;;  %v584_v22 = vadd.s32 %v1279_v4, %v1495_v7 }
  0x3d   : > { %v427_v47 = vsel %vm393_vm9, %v411_v46, 4294967295  ;;  %v289_v51 = vsel %vm1632_vm3, %v273_v11, 4294967295  ;;  %vm389_vm8 = vmand %vm207_vm5, %vm373_vm12  ;;  %vm2026_vm9 = vcmp.ge.s32.totalorder %v1357_v26, 0 }
  0x3e   : > { %v423_v9 = vsel %vm389_vm8, %v407_v48, 4294967295  ;;  %vm403_vm4 = vmand %vm221_vm7, %vm387_vm2  ;;  %vm542_vm8 = vcmp.lt.s32.totalorder %v1394_v34, %v1274_v2  ;;  %vm2028_vm2 = vcmp.ge.s32.totalorder %v1394_v34, 0 }
  0x3f   : > { %v437_v52 = vsel %vm403_vm4, %v421_v13, 4294967295  ;;  %vm553_vm1 = vmand %vm207_vm5, %vm537_vm6  ;;  %vm379_vm5 = vcmp.lt.s32.totalorder %v1357_v26, %v1439_v49  ;;  %vm386_vm6 = vcmp.lt.s32.totalorder %v1495_v7, %v1439_v49 }
  0x40   : > { %vm390_vm15 = vmand %vm2025_vm14, %vm374_vm0  ;;  %vm2029_vm14 = vcmp.ge.s32.totalorder %v1397_v36, 0 }
  0x41   : > { %vm395_vm12 = vmand %vm2026_vm9, %vm379_vm5  ;;  %vm547_vm5 = vcmp.lt.s32.totalorder %v1397_v36, %v1274_v2  ;;  %vm546_vm9 = vcmp.lt.s32.totalorder %v1400_v37, %v1274_v2  ;;  %v585_v37 = vadd.s32 %v1279_v4, %v1616_v44 }
  0x42   : > { %318 = vperm.xlu0 %1067, %v283_v54   ;;  %v408_v54 = vadd.s32 %v1447_v50, %v1285_v6  ;;  %vm398_vm3 = vmand %vm2027_vm10, %vm382_vm11 }
  0x43   : > { %1062 = vset.pattern.permute.xlu2 %v1178_v58  ;;  %330 = vperm.xlu1 %1060, %v287_v55   ;;  %v587_v55 = vsel %vm553_vm1, %v571_v53, 4294967295  ;;  %v432_v61 = vsel %vm398_vm3, %v416_v59, 4294967295  ;;  %vm558_vm4 = vmand %vm2028_vm2, %vm542_vm8  ;;  %vm383_vm1 = vcmp.lt.s32.totalorder %v1397_v36, %v1439_v49  ;;  %vm551_vm8 = vcmp.lt.s32.totalorder %v1616_v44, %v1274_v2 }
  0x44   : > { %463 = vperm.xlu2 %1062, %v430_v56   ;;  %v424_v23 = vsel %vm390_vm15, %v408_v54, 4294967295  ;;  %v413_v56 = vadd.s32 %v1447_v50, %v1357_v26  ;;  %v592_v63 = vsel %vm558_vm4, %v576_v60, 4294967295  ;;  %vm402_vm0 = vmand %vm220_vm13, %vm386_vm6  ;;  %vm550_vm2 = vcmp.lt.s32.totalorder %v1495_v7, %v1274_v2 }
  0x45   : > { %vm399_vm15 = vmand %vm2029_vm14, %vm383_vm1  ;;  %vm378_vm1 = vcmp.lt.s32.totalorder %v1394_v34, %v1439_v49  ;;  %v409_v7 = vadd.s32 %v1447_v50, %v1302_v10 }
  0x46   : > { %v429_v57 = vsel %vm395_vm12, %v413_v56, 4294967295  ;;  %vm2030_vm12 = vmmov %vm2029_vm14  ;;  %vm2032_vm14 = vcmp.ge.s32.totalorder %v1302_v10, 0 }
  0x47   : > { %vm563_vm11 = vmand %vm2030_vm12, %vm547_vm5  ;;  %vm539_vm5 = vcmp.lt.s32.totalorder %v1302_v10, %v1274_v2 }
  0x48   : > { %vm562_vm3 = vmand %vm2027_vm10, %vm546_vm9  ;;  %v597_v19 = vsel %vm563_vm11, %v581_v3, 4294967295  ;;  %vm538_vm9 = vcmp.lt.s32.totalorder %v1285_v6, %v1274_v2  ;;  %vm2034_vm10 = vcmp.ge.s32.totalorder %v1285_v6, 0 }
  0x49   : > { %vm567_vm4 = vmand %vm221_vm7, %vm551_vm8  ;;  %vm543_vm8 = vcmp.lt.s32.totalorder %v1357_v26, %v1274_v2 }
  0x4a   : > { %327 = vperm.xlu0 %1067, %v286_v14   ;;  %v417_v14 = vadd.s32 %v1447_v50, %v1397_v36  ;;  %vm566_vm6 = vmand %vm220_vm13, %vm550_vm2  ;;  %vm2031_vm13 = vcmp.ge.s32.totalorder %v1394_v34, 0  ;;  %vm2035_vm2 = vcmp.ge.s32.totalorder %v1357_v26, 0 }
  0x4b   : > { %1063 = vset.pattern.permute.xlu1 %v1178_v58  ;;  %v600_v28 = vsel %vm566_vm6, %v584_v22, 4294967295  ;;  %vm394_vm7 = vmand %vm2031_vm13, %vm378_vm1 }
  0x4c   : > { %478 = vperm.xlu2 %1062, %v435_v16   ;;  %475 = vperm.xlu1 %1063, %v434_v17   ;;  %v433_v16 = vsel %vm399_vm15, %v417_v14, 4294967295  ;;  %vm2033_vm12 = vmmov %vm2032_vm14 }
  0x4d   : > { %vm555_vm11 = vmand %vm2033_vm12, %vm539_vm5 }
  0x52   : > { %333 = vperm.xlu0 %1067, %v288_v20   ;;  %v596_v20 = vsel %vm562_vm3, %v580_v18, 4294967295  ;;  %vm554_vm3 = vmand %vm2034_vm10, %vm538_vm9 }
  0x54   : > { %1065 = vset.pattern.permute.xlu2 %v1176_v0  ;;  %1064 = vset.pattern.permute.xlu1 %v1176_v0 }
  0x55   : > { %630 = vperm.xlu2 %1065, %v595_v29   ;;  %627 = vperm.xlu1 %1064, %v594_v30   ;;  %v412_v30 = vadd.s32 %v1447_v50, %v1394_v34  ;;  %v573_v50 = vadd.s32 %v1279_v4, %v1302_v10 }
  0x57   : > { %v428_v32 = vsel %vm394_vm7, %v412_v30, 4294967295  ;;  %v589_v35 = vsel %vm555_vm11, %v573_v50, 4294967295 }
  0x5a   : > { %1072 = vset.pattern.permute.xlu0 %v1178_v58 }
  0x5b   : > { %466 = vperm.xlu0 %1072, %v431_v41  }
  0x5d   : > { %1068 = vset.pattern.permute.xlu2 %v1178_v58  ;;  %642 = vperm.xlu1 %1064, %v599_v43  }
  0x5e   : > { %439 = vperm.xlu2 %1068, %v422_v45  }
  0x63   : > { %454 = vperm.xlu0 %1072, %v427_v47  }
  0x65   : > { %1069 = vset.pattern.permute.xlu1 %v1178_v58 }
  0x66   : > { %442 = vperm.xlu1 %1069, %v423_v9   ;;  %451 = vperm.xlu2 %1068, %v426_v15   ;;  %v436_v15 = vsel %vm402_vm0, %v420_v12, 4294967295  ;;  %vm375_vm0 = vcmp.lt.s32.totalorder %v1302_v10, %v1439_v49  ;;  %v577_v10 = vadd.s32 %v1279_v4, %v1357_v26 }
  0x67   : > { %vm391_vm15 = vmand %vm2032_vm14, %vm375_vm0 }
  0x68   : > { %v425_v49 = vsel %vm391_vm15, %v409_v7, 4294967295 }
  0x6b   : > { %484 = vperm.xlu0 %1072, %v437_v52  }
  0x6e   : > { %1070 = vset.pattern.permute.xlu1 %v1176_v0  ;;  %1071 = vset.pattern.permute.xlu2 %v1176_v0 }
  0x6f   : > { %603 = vperm.xlu1 %1070, %v586_v27   ;;  %606 = vperm.xlu2 %1071, %v587_v55   ;;  %v601_v27 = vsel %vm567_vm4, %v585_v37, 4294967295  ;;  %vm559_vm4 = vmand %vm2035_vm2, %vm543_vm8 }
  0x70   : > { %v593_v41 = vsel %vm559_vm4, %v577_v10, 4294967295 }
  0x73   : > { %445 = vperm.xlu0 %1072, %v424_v23  }
  0x77   : > { %615 = vperm.xlu1 %1070, %v590_v5   ;;  %618 = vperm.xlu2 %1071, %v591_v40   ;;  %v572_v5 = vadd.s32 %v1279_v4, %v1285_v6  ;;  %v204_v4 = vlaneseq }
  0x79   : > { %v588_v38 = vsel %vm554_vm3, %v572_v5, 4294967295  ;;  %v1794_v26 = vand.u32 127, %v204_v4  ;;  %vm734_vm3 = vcmask 130048  }
  0x7b   : > { %460 = vperm.xlu0 %1072, %v429_v57  }
  0x7d   : > { %v1689_v62 = vpop.permute.xlu2 %303 }
  0x7f   : > { %1073 = vset.pattern.permute.xlu1 %v1177_v1  ;;  %1074 = vset.pattern.permute.xlu2 %v1178_v58 }
  0x80   : > { %336 = vperm.xlu1 %1073, %v289_v51   ;;  %469 = vperm.xlu2 %1074, %v432_v61  }
  0x83   : > { %1082 = vset.pattern.permute.xlu0 %v1176_v0 }
  0x84   : > { %621 = vperm.xlu0 %1082, %v592_v63  }
  0x85   : > { %v1706_v17 = vpop.permute.xlu2 %306 }
  0x88   : > { %1075 = vset.pattern.permute.xlu1 %v1178_v58  ;;  %481 = vperm.xlu2 %1074, %v436_v15  }
  0x89   : > { %472 = vperm.xlu1 %1075, %v433_v16  }
  0x8d   : > { %v1727_v36 = vpop.permute.xlu2 %315 }
  0x8e   : > { %vm346_vm0 = vcmp.eq.s32.totalorder %v1727_v36, %v1794_v26 }
  0x8f   : > { %v362_v51 = vsel %vm346_vm0, 1, %v1177_v1 }
  0x90   : > { %1077 = vset.pattern.permute.xlu2 %v1176_v0 }
  0x91   : > { %1076 = vset.pattern.permute.xlu1 %v1176_v0  ;;  %636 = vperm.xlu2 %1077, %v597_v19  }
  0x92   : > { %633 = vperm.xlu1 %1076, %v596_v20  }
  0x93   : > { %v1729_v21 = vpop.permute.xlu0 %639 }
  0x94   : > { %vm662_vm7 = vcmp.eq.s32.totalorder %v1729_v21, %v1794_v26 }
  0x95   : > { %v1739_v24 = vpop.permute.xlu1 %297  ;;  %v1749_v25 = vpop.permute.xlu2 %324  ;;  %v678_v13 = vsel %vm662_vm7, 1, %v1177_v1 }
  0x99   : > { %648 = vperm.xlu2 %1077, %v601_v27  }
  0x9a   : > { %645 = vperm.xlu1 %1076, %v600_v28  }
  0x9c   : > { %v1745_v29 = vpop.permute.xlu0 %291 }
  0x9d   : > { %v1755_v31 = vpop.permute.xlu1 %300  ;;  %vm338_vm4 = vcmp.eq.s32.totalorder %v1745_v29, %v1794_v26 }
  0xa1   : > { %1079 = vset.pattern.permute.xlu2 %v1178_v58 }
  0xa2   : > { %1078 = vset.pattern.permute.xlu1 %v1178_v58  ;;  %457 = vperm.xlu2 %1079, %v428_v32   ;;  %v464_v58 = vpop.permute.xlu2 %463 }
  0xa3   : > { %448 = vperm.xlu1 %1078, %v425_v49   ;;  %vm494_vm13 = vcmp.eq.s32.totalorder %v464_v58, %v1794_v26  ;;  %v354_v58 = vsel %vm338_vm4, 1, %v1177_v1 }
  0xa4   : > { %v1763_v34 = vpop.permute.xlu0 %294  ;;  %v510_v9 = vsel %vm494_vm13, 1, %v1177_v1  ;;  %vm343_vm13 = vcmp.eq.s32.totalorder %v1706_v17, %v1794_v26 }
  0xa5   : > { %v1769_v33 = vpop.permute.xlu1 %312  ;;  %v526_v23 = vadd.s32 %v510_v9, %v362_v51  ;;  %vm339_vm2 = vcmp.eq.s32.totalorder %v1763_v34, %v1794_v26 }
  0xa6   : > { %v355_v32 = vsel %vm339_vm2, 1, %v1177_v1 }
  0xaa   : > { %1081 = vset.pattern.permute.xlu2 %v1176_v0  ;;  %v479_v6 = vpop.permute.xlu2 %478 }
  0xab   : > { %1080 = vset.pattern.permute.xlu1 %v1176_v0  ;;  %612 = vperm.xlu2 %1081, %v589_v35   ;;  %v962_v0 = vld [vmem:[%s1983_s3] sm:$0xff]  ;;  %vm499_vm15 = vcmp.eq.s32.totalorder %v479_v6, %v1794_v26 }
  0xac   : > { %v1779_v39 = vpop.permute.xlu0 %309  ;;  %609 = vperm.xlu1 %1080, %v588_v38   ;;  %1013 = vmatpush.bf16.msra.mxu3 %v962_v0  ;;  %v515_v56 = vsel %vm499_vm15, 1, %v1177_v1 }
  0xad   : > { %v1783_v40 = vpop.permute.xlu1 %321  ;;  %1012 = vmatpush.bf16.msra.mxu2 %v962_v0  ;;  %766 = vmatpush.bf16.msra.mxu0 %v962_v0 }
  0xae   : > { %1011 = vmatpush.bf16.msra.mxu1 %v962_v0  ;;  %v359_v0 = vsel %vm343_vm13, 1, %v1177_v1  ;;  %vm348_vm2 = vcmp.eq.s32.totalorder %v1783_v40, %v1794_v26 }
  0xb2   : > { %v631_v2 = vpop.permute.xlu2 %630 }
  0xb3   : > { %vm659_vm9 = vcmp.eq.s32.totalorder %v631_v2, %v1794_v26 }
  0xb4   : > { %v319_v42 = vpop.permute.xlu0 %318  ;;  %624 = vperm.xlu1 %1080, %v593_v41   ;;  %v675_v59 = vsel %vm659_vm9, 1, %v1177_v1 }
  0xb5   : > { %v331_v43 = vpop.permute.xlu1 %330  ;;  %vm347_vm12 = vcmp.eq.s32.totalorder %v319_v42, %v1794_v26 }
  0xb6   : > { %vm351_vm5 = vcmp.eq.s32.totalorder %v331_v43, %v1794_v26  ;;  %v363_v60 = vsel %vm347_vm12, 1, %v1177_v1 }
  0xb7   : > { %v367_v57 = vsel %vm351_vm5, 1, %v1177_v1  ;;  %vm342_vm5 = vcmp.eq.s32.totalorder %v1689_v62, %v1794_v26 }
  0xb8   : > { %v531_v15 = vadd.s32 %v515_v56, %v367_v57 }
  0xba   : > { %v440_v46 = vpop.permute.xlu2 %439 }
  0xbc   : > { %v328_v44 = vpop.permute.xlu0 %327 }
  0xbd   : > { %vm350_vm1 = vcmp.eq.s32.totalorder %v328_v44, %v1794_v26 }
  0xbe   : > { %v476_v45 = vpop.permute.xlu1 %475  ;;  %v366_v48 = vsel %vm350_vm1, 1, %v1177_v1 }
  0xbf   : > { %vm498_vm6 = vcmp.eq.s32.totalorder %v476_v45, %v1794_v26 }
  0xc0   : > { %v514_v47 = vsel %vm498_vm6, 1, %v1177_v1  ;;  %vm486_vm6 = vcmp.eq.s32.totalorder %v440_v46, %v1794_v26 }
  0xc1   : > { %v530_v52 = vadd.s32 %v514_v47, %v366_v48  ;;  %v502_v35 = vsel %vm486_vm6, 1, %v1177_v1 }
  0xc2   : > { %v452_v53 = vpop.permute.xlu2 %451  ;;  %v518_v29 = vadd.s32 %v502_v35, %v354_v58 }
  0xc3   : > { %v694_v16 = vadd.s32 %v678_v13, %v530_v52 }
  0xc4   : > { %v1792_v11 = vpop.permute.xlu0 %333 }
  0xc5   : > { %v710_v21 = vcvt.s32.f32 %v694_v16 }
  0xc7   : > { %v628_v8 = vpop.permute.xlu1 %627 }
  0xc8   : > { %vm658_vm14 = vcmp.eq.s32.totalorder %v628_v8, %v1794_v26  ;;  %v358_v8 = vsel %vm342_vm5, 1, %v1177_v1  ;;  %vm341_vm5 = vcmp.eq.s32.totalorder %v1755_v31, %v1794_v26 }
  0xc9   : > { %v674_v54 = vsel %vm658_vm14, 1, %v1177_v1  ;;  %vm490_vm14 = vcmp.eq.s32.totalorder %v452_v53, %v1794_v26 }
  0xca   : > { %v690_v63 = vadd.s32 %v674_v54, %v526_v23  ;;  %v607_v37 = vpop.permute.xlu2 %606  ;;  %v506_v44 = vsel %vm490_vm14, 1, %v1177_v1 }
  0xcb   : > { %vm651_vm1 = vcmp.eq.s32.totalorder %v607_v37, %v1794_v26  ;;  %v522_v48 = vadd.s32 %v506_v44, %v358_v8 }
  0xcc   : > { %v706_v20 = vcvt.s32.f32 %v690_v63  ;;  %v667_v34 = vsel %vm651_vm1, 1, %v1177_v1 }
  0xcd   : > { %v467_v55 = vpop.permute.xlu0 %466 }
  0xce   : > { %vm495_vm11 = vcmp.eq.s32.totalorder %v467_v55, %v1794_v26 }
  0xcf   : > { %v511_v61 = vsel %vm495_vm11, 1, %v1177_v1  ;;  %v643_v12 = vpop.permute.xlu1 %642  ;;  %vm349_vm11 = vcmp.eq.s32.totalorder %v1749_v25, %v1794_v26  ;;  %v364_v25 = vsel %vm348_vm2, 1, %v1177_v1 }
  0xd0   : > { %v527_v14 = vadd.s32 %v511_v61, %v363_v60  ;;  %vm663_vm10 = vcmp.eq.s32.totalorder %v643_v12, %v1794_v26 }
  0xd1   : > { %v679_v3 = vsel %vm663_vm10, 1, %v1177_v1 }
  0xd2   : > { %v691_v18 = vadd.s32 %v675_v59, %v527_v14  ;;  %v695_v19 = vadd.s32 %v679_v3, %v531_v15  ;;  %v619_v50 = vpop.permute.xlu2 %618  ;;  %v365_v59 = vsel %vm349_vm11, 1, %v1177_v1  ;;  %vm340_vm11 = vcmp.eq.s32.totalorder %v1739_v24, %v1794_v26 }
  0xd3   : > { %vm655_vm15 = vcmp.eq.s32.totalorder %v619_v50, %v1794_v26  ;;  %v356_v31 = vsel %vm340_vm11, 1, %v1177_v1 }
  0xd4   : > { %v707_v36 = vcvt.s32.f32 %v691_v18  ;;  %v711_v22 = vcvt.s32.f32 %v695_v19  ;;  %v671_v45 = vsel %vm655_vm15, 1, %v1177_v1 }
  0xd5   : > { %v455_v49 = vpop.permute.xlu0 %454 }
  0xd6   : > { %v718_v27 = vpack.c.bf16 %v707_v36, %v706_v20  ;;  %v720_v28 = vpack.c.bf16 %v711_v22, %v710_v21  ;;  %vm491_vm0 = vcmp.eq.s32.totalorder %v455_v49, %v1794_v26 }
  0xd7   : > { %v507_v6 = vsel %vm491_vm0, 1, %v1177_v1 }
  0xd8   : > { %953 = vmatmul.msk.bf16.vlgmr.msra.gmra.mxu2 %vm734_vm3, %v718_v27  ;;  %v443_v30 = vpop.permute.xlu1 %442  ;;  %955 = vmatmul.msk.bf16.vlgmr.msra.gmra.mxu3 %vm734_vm3, %v720_v28  ;;  %v523_v43 = vadd.s32 %v507_v6, %v359_v0 }
  0xd9   : > { %vm487_vm8 = vcmp.eq.s32.totalorder %v443_v30, %v1794_v26 }
  0xda   : > { %v503_v7 = vsel %vm487_vm8, 1, %v1177_v1  ;;  %v470_v4 = vpop.permute.xlu2 %469  ;;  %v687_v51 = vadd.s32 %v671_v45, %v523_v43 }
  0xdb   : > { %v519_v5 = vadd.s32 %v503_v7, %v355_v32  ;;  %vm496_vm10 = vcmp.eq.s32.totalorder %v470_v4, %v1794_v26 }
  0xdc   : > { %v703_v13 = vcvt.s32.f32 %v687_v51  ;;  %v512_v61 = vsel %vm496_vm10, 1, %v1177_v1 }
  0xdd   : > { %v683_v10 = vadd.s32 %v667_v34, %v519_v5  ;;  %v485_v63 = vpop.permute.xlu0 %484  ;;  %v528_v16 = vadd.s32 %v512_v61, %v364_v25 }
  0xde   : > { %vm501_vm4 = vcmp.eq.s32.totalorder %v485_v63, %v1794_v26  ;;  %v1916_v63 = vld [vmem:[%s1984_s4] ss:$0 sm:$0xff] }
  0xdf   : > { %v699_v17 = vcvt.s32.f32 %v683_v10  ;;  %v517_v40 = vsel %vm501_vm4, 1, %v1177_v1 }
  0xe1   : > { %v604_v38 = vpop.permute.xlu1 %603 }
  0xe2   : > { %vm650_vm7 = vcmp.eq.s32.totalorder %v604_v38, %v1794_v26  ;;  %v482_v54 = vpop.permute.xlu2 %481 }
  0xe3   : > { %v666_v41 = vsel %vm650_vm7, 1, %v1177_v1  ;;  %vm500_vm0 = vcmp.eq.s32.totalorder %v482_v54, %v1794_v26  ;;  %vm352_vm7 = vcmp.eq.s32.totalorder %v1792_v11, %v1794_v26 }
  0xe4   : > { %v682_v42 = vadd.s32 %v666_v41, %v518_v29  ;;  %v516_v22 = vsel %vm500_vm0, 1, %v1177_v1  ;;  %v368_v30 = vsel %vm352_vm7, 1, %v1177_v1 }
  0xe5   : > { %v446_v7 = vpop.permute.xlu0 %445  ;;  %v532_v49 = vadd.s32 %v516_v22, %v368_v30 }
  0xe6   : > { %v698_v2 = vcvt.s32.f32 %v682_v42  ;;  %v357_v42 = vsel %vm341_vm5, 1, %v1177_v1 }
  0xe8   : > { %v714_v46 = vpack.c.bf16 %v699_v17, %v698_v2 }
  0xe9   : > { %v616_v47 = vpop.permute.xlu1 %615 }
  0xea   : > { %vm654_vm9 = vcmp.eq.s32.totalorder %v616_v47, %v1794_v26  ;;  %949 = vmatmul.msk.bf16.vlgmr.msra.gmra.mxu0 %vm734_vm3, %v714_v46 }
  0xeb   : > { %v670_v62 = vsel %vm654_vm9, 1, %v1177_v1  ;;  %v637_v23 = vpop.permute.xlu2 %636  ;;  %vm488_vm9 = vcmp.eq.s32.totalorder %v446_v7, %v1794_v26 }
  0xec   : > { %v686_v9 = vadd.s32 %v670_v62, %v522_v48  ;;  %vm661_vm8 = vcmp.eq.s32.totalorder %v637_v23, %v1794_v26  ;;  %v504_v43 = vsel %vm488_vm9, 1, %v1177_v1 }
  0xed   : > { %v677_v12 = vsel %vm661_vm8, 1, %v1177_v1  ;;  %v461_v10 = vpop.permute.xlu0 %460  ;;  %vm344_vm8 = vcmp.eq.s32.totalorder %v1779_v39, %v1794_v26  ;;  %v520_v45 = vadd.s32 %v504_v43, %v356_v31 }
  0xee   : > { %v702_v52 = vcvt.s32.f32 %v686_v9  ;;  %vm493_vm4 = vcmp.eq.s32.totalorder %v461_v10, %v1794_v26  ;;  %v360_v47 = vsel %vm344_vm8, 1, %v1177_v1 }
  0xef   : > { %v509_v62 = vsel %vm493_vm4, 1, %v1177_v1 }
  0xf0   : > { %v716_v53 = vpack.c.bf16 %v703_v13, %v702_v52 }
  0xf2   : > { %v337_v55 = vpop.permute.xlu1 %336  ;;  %951 = vmatmul.msk.bf16.vlgmr.msra.gmra.mxu1 %vm734_vm3, %v716_v53 }
  0xf3   : > { %vm353_vm6 = vcmp.eq.s32.totalorder %v337_v55, %v1794_v26  ;;  %v649_v14 = vpop.permute.xlu2 %648 }
  0xf4   : > { %v369_v18 = vsel %vm353_vm6, 1, %v1177_v1  ;;  %vm665_vm13 = vcmp.eq.s32.totalorder %v649_v14, %v1794_v26 }
  0xf5   : > { %v533_v36 = vadd.s32 %v517_v40, %v369_v18  ;;  %v681_v27 = vsel %vm665_vm13, 1, %v1177_v1 }
  0xf6   : > { %v622_v2 = vpop.permute.xlu0 %621 }
  0xf7   : > { %v697_v50 = vadd.s32 %v681_v27, %v533_v36  ;;  %vm656_vm6 = vcmp.eq.s32.totalorder %v622_v2, %v1794_v26 }
  0xf8   : > { %v672_v9 = vsel %vm656_vm6, 1, %v1177_v1 }
  0xf9   : > { %v713_v35 = vcvt.s32.f32 %v697_v50 }
  0xfb   : > { %v473_v56 = vpop.permute.xlu1 %472 }
  0xfc   : > { %vm497_vm12 = vcmp.eq.s32.totalorder %v473_v56, %v1794_v26  ;;  %v458_v5 = vpop.permute.xlu2 %457 }
  0xfd   : > { %v513_v57 = vsel %vm497_vm12, 1, %v1177_v1  ;;  %vm492_vm10 = vcmp.eq.s32.totalorder %v458_v5, %v1794_v26 }
  0xfe   : > { %v529_v60 = vadd.s32 %v513_v57, %v365_v59  ;;  %v508_v24 = vsel %vm492_vm10, 1, %v1177_v1 }
  0xff   : > { %v524_v48 = vadd.s32 %v508_v24, %v360_v47 }
 0x100   : > { %v693_v3 = vadd.s32 %v677_v12, %v529_v60 }
 0x101   : > { %v688_v55 = vadd.s32 %v672_v9, %v524_v48 }
 0x102   : > { %v709_v21 = vcvt.s32.f32 %v693_v3 }
 0x103   : > { %v704_v56 = vcvt.s32.f32 %v688_v55 }
 0x104   : > { %v634_v15 = vpop.permute.xlu1 %633 }
 0x105   : > { %vm660_vm1 = vcmp.eq.s32.totalorder %v634_v15, %v1794_v26  ;;  %v613_v6 = vpop.permute.xlu2 %612 }
 0x106   : > { %v676_v19 = vsel %vm660_vm1, 1, %v1177_v1  ;;  %vm653_vm12 = vcmp.eq.s32.totalorder %v613_v6, %v1794_v26  ;;  %vm345_vm1 = vcmp.eq.s32.totalorder %v1769_v33, %v1794_v26 }
 0x107   : > { %v692_v20 = vadd.s32 %v676_v19, %v528_v16  ;;  %v669_v17 = vsel %vm653_vm12, 1, %v1177_v1  ;;  %v361_v52 = vsel %vm345_vm1, 1, %v1177_v1 }
 0x108   : > { %v525_v54 = vadd.s32 %v509_v62, %v361_v52 }
 0x109   : > { %v708_v37 = vcvt.s32.f32 %v692_v20 }
 0x10b   : > { %v719_v28 = vpack.c.bf16 %v709_v21, %v708_v37 }
 0x10c   : > { %v646_v32 = vpop.permute.xlu1 %645 }
 0x10d   : > { %vm664_vm14 = vcmp.eq.s32.totalorder %v646_v32, %v1794_v26  ;;  %954 = vmatmul.msk.bf16.gmra.mxu2 %vm734_vm3, %v719_v28 }
 0x10e   : > { %v680_v11 = vsel %vm664_vm14, 1, %v1177_v1 }
 0x10f   : > { %v696_v58 = vadd.s32 %v680_v11, %v532_v49 }
 0x111   : > { %v712_v34 = vcvt.s32.f32 %v696_v58 }
 0x113   : > { %v721_v38 = vpack.c.bf16 %v713_v35, %v712_v34 }
 0x115   : > { %v449_v29 = vpop.permute.xlu1 %448  ;;  %956 = vmatmul.msk.bf16.gmra.mxu3 %vm734_vm3, %v721_v38 }
 0x116   : > { %vm489_vm15 = vcmp.eq.s32.totalorder %v449_v29, %v1794_v26 }
 0x117   : > { %v505_v41 = vsel %vm489_vm15, 1, %v1177_v1 }
 0x118   : > { %v521_v0 = vadd.s32 %v505_v41, %v357_v42 }
 0x11a   : > { %v685_v4 = vadd.s32 %v669_v17, %v521_v0 }
 0x11c   : > { %v701_v39 = vcvt.s32.f32 %v685_v4 }
 0x11e   : > { %v610_v44 = vpop.permute.xlu1 %609 }
 0x11f   : > { %vm652_vm2 = vcmp.eq.s32.totalorder %v610_v44, %v1794_v26 }
 0x120   : > { %v668_v46 = vsel %vm652_vm2, 1, %v1177_v1 }
 0x121   : > { %v684_v8 = vadd.s32 %v668_v46, %v520_v45 }
 0x123   : > { %v700_v51 = vcvt.s32.f32 %v684_v8 }
 0x125   : > { %v715_v13 = vpack.c.bf16 %v701_v39, %v700_v51 }
 0x126   : > { %v625_v53 = vpop.permute.xlu1 %624 }
 0x127   : > { %vm657_vm0 = vcmp.eq.s32.totalorder %v625_v53, %v1794_v26  ;;  %950 = vmatmul.msk.bf16.gmra.mxu0 %vm734_vm3, %v715_v13 }
 0x128   : > { %v673_v33 = vsel %vm657_vm0, 1, %v1177_v1 }
 0x129   : > { %v689_v23 = vadd.s32 %v673_v33, %v525_v54 }
 0x12b   : > { %v705_v57 = vcvt.s32.f32 %v689_v23 }
 0x12d   : > { %v717_v59 = vpack.c.bf16 %v705_v57, %v704_v56 }
 0x12f   : > { %952 = vmatmul.msk.bf16.gmra.mxu1 %vm734_vm3, %v717_v59 }
 0x15b   : > { %v788_v60 = vpop.f32.mrf.mxu2  ;;  %v798_v61 = vpop.f32.mrf.mxu3 }
 0x15c   : > { %v789_v26 = vadd.f32 %v1916_v63, %v788_v60  ;;  %v799_v12 = vadd.f32 %v1916_v63, %v798_v61 }
 0x15e   : > { %v816_v16 = vmax.f32 %v789_v26, 0.0  ;;  %v820_v40 = vmax.f32 %v799_v12, 0.0 }
 0x163   : > { %v790_v25 = vpop.f32.mrf.mxu2  ;;  %v800_v1 = vpop.f32.mrf.mxu3 }
 0x164   : > { %v791_v14 = vadd.f32 %v1916_v63, %v790_v25  ;;  %v801_v15 = vadd.f32 %v1916_v63, %v800_v1 }
 0x166   : > { %v817_v3 = vmax.f32 %v791_v14, 0.0  ;;  %v821_v18 = vmax.f32 %v801_v15, 0.0 }
 0x167   : > { %v768_v20 = vpop.f32.mrf.mxu0 }
 0x168   : > { %v987_v19 = vpack.c.bf16 %v817_v3, %v816_v16  ;;  %v997_v36 = vpack.c.bf16 %v821_v18, %v820_v40  ;;  %v769_v21 = vadd.f32 %v1916_v63, %v768_v20 }
 0x16a   : > { %1007 = vst [vmem:[%s1925_s7 + $0x20] sm:$0xff] %v987_v19   ;;  %v808_v28 = vmax.f32 %v769_v21, 0.0 }
 0x16b   : > { %1009 = vst [vmem:[%s1925_s7 + $0x30] sm:$0xff] %v997_v36  }
 0x16f   : > { %v770_v37 = vpop.f32.mrf.mxu0  ;;  %v778_v22 = vpop.f32.mrf.mxu1 }
 0x170   : > { %v771_v27 = vadd.f32 %v1916_v63, %v770_v37  ;;  %v779_v32 = vadd.f32 %v1916_v63, %v778_v22 }
 0x172   : > { %v809_v30 = vmax.f32 %v771_v27, 0.0  ;;  %v812_v5 = vmax.f32 %v779_v32, 0.0 }
 0x174   : > { %v967_v7 = vpack.c.bf16 %v809_v30, %v808_v28 }
 0x176   : > { %968 = vst [vmem:[%s1925_s7] sm:$0xff] %v967_v7  }
 0x177   : > { %v780_v49 = vpop.f32.mrf.mxu1 }
 0x178   : > { %v781_v50 = vadd.f32 %v1916_v63, %v780_v49 }
 0x17a   : > { %v813_v11 = vmax.f32 %v781_v50, 0.0 }
 0x17c   : > { %v977_v58 = vpack.c.bf16 %v813_v11, %v812_v5 }
 0x17e   : > { %1005 = vst [vmem:[%s1925_s7 + $0x10] sm:$0xff] %v977_v58  }
 0x190   : > { %v793_v35 = vpop.f32.mrf.mxu2 }
 0x191   : > { %v794_v34 = vadd.f32 %v1916_v63, %v793_v35 }
 0x193   : > { %v818_v6 = vmax.f32 %v794_v34, 0.0 }
 0x198   : > { %v795_v38 = vpop.f32.mrf.mxu2  ;;  %v803_v29 = vpop.f32.mrf.mxu3 }
 0x199   : > { %v796_v10 = vadd.f32 %v1916_v63, %v795_v38  ;;  %v804_v0 = vadd.f32 %v1916_v63, %v803_v29 }
 0x19b   : > { %v819_v41 = vmax.f32 %v796_v10, 0.0  ;;  %v822_v31 = vmax.f32 %v804_v0, 0.0 }
 0x19d   : > { %v992_v42 = vpack.c.bf16 %v819_v41, %v818_v6 }
 0x19f   : > { %1008 = vst [vmem:[%s1925_s7 + $0x28] sm:$0xff] %v992_v42  }
 0x1a0   : > { %v805_v43 = vpop.f32.mrf.mxu3 }
 0x1a1   : > { %v806_v17 = vadd.f32 %v1916_v63, %v805_v43 }
 0x1a3   : > { %v823_v2 = vmax.f32 %v806_v17, 0.0 }
 0x1a4   : > { %v773_v44 = vpop.f32.mrf.mxu0 }
 0x1a5   : > { %v1002_v45 = vpack.c.bf16 %v823_v2, %v822_v31  ;;  %v774_v4 = vadd.f32 %v1916_v63, %v773_v44 }
 0x1a7   : > { %1010 = vst [vmem:[%s1925_s7 + $0x38] sm:$0xff] %v1002_v45   ;;  %v810_v47 = vmax.f32 %v774_v4, 0.0 }
 0x1ac   : > { %v775_v24 = vpop.f32.mrf.mxu0  ;;  %v783_v46 = vpop.f32.mrf.mxu1 }
 0x1ad   : > { %v776_v8 = vadd.f32 %v1916_v63, %v775_v24  ;;  %v784_v51 = vadd.f32 %v1916_v63, %v783_v46 }
 0x1af   : > { %v811_v48 = vmax.f32 %v776_v8, 0.0  ;;  %v814_v13 = vmax.f32 %v784_v51, 0.0 }
 0x1b1   : > { %v972_v39 = vpack.c.bf16 %v811_v48, %v810_v47 }
 0x1b3   : > { %1004 = vst [vmem:[%s1925_s7 + $0x8] sm:$0xff] %v972_v39  }
 0x1b4   : > { %v785_v62 = vpop.f32.mrf.mxu1 }
 0x1b5   : > { %v786_v9 = vadd.f32 %v1916_v63, %v785_v62 }
 0x1b7   : > { %v815_v52 = vmax.f32 %v786_v9, 0.0 }
 0x1b9   : > { %v982_v53 = vpack.c.bf16 %v815_v52, %v814_v13 }
 0x1bb   : > { %1006 = vst [vmem:[%s1925_s7 + $0x18] sm:$0xff] %v982_v53  }
 0x1bc   : > { %1135 = shalt.err (!%p1132_p3)
}
 0x1bd   : > { %s1179_s24 = smov 64   ;;  %s1180_s25 = smov 4  }
 0x1be   : > { %1014 = dma.vmem_to_hbm [thread:$0]  (%p1255_p5), %s870_s15, 1024, %s872_s16, %s857_s1, %s1179_s24, %s1179_s24, %s1180_s25  }
 0x1bf PF: > { %p1020_p4 = scmp.ge.s32.totalorder %s1172_s28, 2  ;;  %s886_s29 = sand.u32 1, %s1160_s26  }
 0x1c0   : > { %s887_s6 = scalar_lea.sflag [#allocation6], %s886_s29 }
 0x1c1   : > { %p1017_p7 = pnand %p1020_p4, %p1259_p6 }
 0x1c3   : > { %p1018_p8 = pneg %p1017_p7 }
 0x1c5   : > { %1155 = dma.done.wait (%p1018_p8), %s887_s6, 1024  }
 0x1c6   : > { %1157 = vsyncadd (%p1018_p8), %s887_s6, 4294966272  ;;  %p28_p9 = scmp.ge.s32.totalorder %s1242_s30, 4   ;;  %s2036_s26 = smov %s1164_s27 }
 0x1c7   : > { %s2037_s27 = smov %s1168_s0  ;;  %s2038_s0 = smov %s1253_s8 }
 0x1c8   : > { %s2039_s28 = smov %s1242_s30  ;;  %30 = sbr.rel (!%p28_p9) target bundleno = 10 (0xa), region = 67 }
 0x1cd   :  { %893 = vsyncpa [#allocation6], 1 }
 0x1ce   :  { %895 = vsyncpa [#allocation6 + $0x1], 1 }

</bundles_post_ra>
